<compile_context>
chip_gen: v5e
topology: v5e:2x2
jax: 0.10.0
libtpu: 0.0.40
codegen_flags: <defaults>
</compile_context>

<pallas_src>
import functools

import jax
import jax.numpy as jnp
from jax.experimental import pallas as pl
from jax.experimental.pallas import tpu as pltpu


def _focus_conv_kernel(x_ref, w_ref, shift_ref, o_ref):
    # x_ref:     (Cin,  TS)   activation slab, spatial in lanes
    # w_ref:     (Cout, Cin)  BN-folded pointwise conv weight (resident)
    # shift_ref: (Cout, 1)    BN shift = beta - mean * scale (resident, f32)
    # o_ref:     (Cout, TS)
    acc = jnp.dot(w_ref[...], x_ref[...], preferred_element_type=jnp.float32)
    y = acc + shift_ref[...]                 # broadcast over lanes
    o_ref[...] = (y * jax.nn.sigmoid(y)).astype(o_ref.dtype)   # SiLU


@functools.partial(jax.jit, static_argnames=("ts", "compute_dtype"))
def focus_forward(x, weight, gamma, beta, running_mean, running_var,
                  eps=1e-5, ts=1024, compute_dtype=jnp.float32):
    """x: (N, C1, H, W) NCHW.  Returns (N, C2, H//2, W//2) float32.

    ts: spatial tile (lanes), rounded to a multiple of 128.
    compute_dtype: dtype of the MXU operands (f32 or bf16); accumulation and
                   the BN/SiLU epilogue are always f32.
    """
    n, c1, h, w = x.shape
    c2 = weight.shape[0]
    cin = 4 * c1
    ho, wo = h // 2, w // 2
    s = ho * wo

    # --- glue: space-to-depth (matches torch.cat channel order), stays NCHW ---
    patches = jnp.concatenate(
        [x[:, :, ::2, ::2],     # even rows, even cols
         x[:, :, 1::2, ::2],    # odd rows,  even cols
         x[:, :, ::2, 1::2],    # even rows, odd cols
         x[:, :, 1::2, 1::2]],  # odd rows,  odd cols
        axis=1)                                   # (N, Cin, Ho, Wo)
    xr = patches.reshape(n, cin, s)               # contiguous reshape, no transpose

    # --- spatial tiling: lane-dense tiles, pad spatial up to a tile multiple ---
    ts = max(128, (int(ts) // 128) * 128)
    s_pad_min = -(-s // 128) * 128                # round_up(s, 128)
    ts_eff = min(ts, s_pad_min)
    s_pad = -(-s // ts_eff) * ts_eff              # round_up(s, ts_eff)
    if s_pad != s:
        xr = jnp.pad(xr, ((0, 0), (0, 0), (0, s_pad - s)))

    # --- fold BN into the pointwise conv weight (host-side) ---
    scale = (gamma / jnp.sqrt(running_var + eps)).astype(jnp.float32)   # (C2,)
    w_folded = (weight.reshape(c2, cin).astype(jnp.float32)
                * scale[:, None])                                       # (C2, Cin)
    shift = (beta.astype(jnp.float32)
             - running_mean.astype(jnp.float32) * scale).reshape(c2, 1)  # (C2, 1)

    xr = xr.astype(compute_dtype)
    w_folded = w_folded.astype(compute_dtype)

    grid = (n, s_pad // ts_eff)
    itemsize = jnp.dtype(compute_dtype).itemsize
    cost = pl.CostEstimate(
        flops=int(2 * n * s_pad * cin * c2),
        transcendentals=int(n * s_pad * c2),
        bytes_accessed=int(n * s_pad * cin * itemsize      # activations in
                           + n * s_pad * c2 * 4            # output
                           + c2 * cin * itemsize + c2 * 4))  # weight + shift

    out = pl.pallas_call(
        _focus_conv_kernel,
        out_shape=jax.ShapeDtypeStruct((n, c2, s_pad), jnp.float32),
        grid_spec=pltpu.PrefetchScalarGridSpec(
            num_scalar_prefetch=0,
            grid=grid,
            in_specs=[
                # activation slab: spatial (multiple of 128) in lanes
                pl.BlockSpec((None, cin, ts_eff), lambda ni, si: (ni, 0, si)),
                # resident weight / shift (constant index_map)
                pl.BlockSpec((c2, cin), lambda ni, si: (0, 0)),
                pl.BlockSpec((c2, 1), lambda ni, si: (0, 0)),
            ],
            out_specs=pl.BlockSpec((None, c2, ts_eff),
                                   lambda ni, si: (ni, 0, si)),
        ),
        compiler_params=pltpu.CompilerParams(
            dimension_semantics=("parallel", "parallel")),
        cost_estimate=cost,
    )(xr, w_folded, shift)

    # drop spatial padding (no-op when s is already a tile multiple), stays NCHW
    return out[:, :, :s].reshape(n, c2, ho, wo)


def _reference(x, weight, gamma, beta, running_mean, running_var, eps=1e-5):
    patches = jnp.concatenate(
        [x[:, :, ::2, ::2], x[:, :, 1::2, ::2],
         x[:, :, ::2, 1::2], x[:, :, 1::2, 1::2]], axis=1)
    y = jnp.einsum('nchw,oc->nohw', patches,
                   weight.reshape(weight.shape[0], -1))
    scale = gamma / jnp.sqrt(running_var + eps)
    shift = beta - running_mean * scale
    y = y * scale[None, :, None, None] + shift[None, :, None, None]
    return y * jax.nn.sigmoid(y)


if __name__ == "__main__":
    # Small shapes consistent with the module: N=2, c1=4, H=W=16, c2=8.
    n, c1, h, w, c2 = 2, 4, 16, 16, 8
    key = jax.random.PRNGKey(0)
    kx, kw, kg, kb, km, kv = jax.random.split(key, 6)

    x = jax.random.normal(kx, (n, c1, h, w), dtype=jnp.float32)

    # Deterministic synthetic parameters (Conv2d weight: (c2, 4*c1, 1, 1)).
    weight = jax.random.normal(kw, (c2, 4 * c1, 1, 1), dtype=jnp.float32) * 0.1
    gamma = 1.0 + 0.1 * jax.random.normal(kg, (c2,), dtype=jnp.float32)
    beta = 0.1 * jax.random.normal(kb, (c2,), dtype=jnp.float32)
    running_mean = 0.05 * jax.random.normal(km, (c2,), dtype=jnp.float32)
    running_var = 1.0 + 0.1 * jax.random.uniform(kv, (c2,), dtype=jnp.float32)

    ref = _reference(x, weight, gamma, beta, running_mean, running_var)

    # f32 operands: tight check (BN fold changes rounding order slightly).
    out = focus_forward(x, weight, gamma, beta, running_mean, running_var,
                        compute_dtype=jnp.float32)
    out = jax.block_until_ready(out)
    assert out.shape == (n, c2, h // 2, w // 2)
    assert jnp.allclose(out, ref, atol=1e-4, rtol=1e-4)

    # bf16 MXU operands (v6e/v7x bandwidth path), f32 accumulation + epilogue.
    out_bf16 = focus_forward(x, weight, gamma, beta, running_mean, running_var,
                             compute_dtype=jnp.bfloat16)
    out_bf16 = jax.block_until_ready(out_bf16)
    assert jnp.allclose(out_bf16, ref, atol=3e-2, rtol=3e-2)

    print("KERNEL_OK")
</pallas_src>

<mosaic_0001>
module attributes {stable_mosaic.version = 11 : i64} {
  func.func @_focus_conv_kernel(%arg0: i32, %arg1: i32, %arg2: memref<1x16x128xf32, #tpu.memory_space<vmem>>, %arg3: memref<8x16xf32, #tpu.memory_space<vmem>>, %arg4: memref<8x1xf32, #tpu.memory_space<vmem>>, %arg5: memref<1x8x128xf32, #tpu.memory_space<vmem>>) attributes {dimension_semantics = [#tpu.dimension_semantics<parallel>, #tpu.dimension_semantics<parallel>], iteration_bounds = array<i64: 2, 1>, scalar_prefetch = 0 : i64, scratch_operands = 0 : i64, tpu.core_type = #tpu.core_type<tc>, window_params = [{transform_indices = @transform_0, window_bounds = array<i64: 1, 16, 128>}, {pipeline_mode = #tpu.pipeline_mode<synchronous>, transform_indices = @transform_1, window_bounds = array<i64: 8, 16>}, {pipeline_mode = #tpu.pipeline_mode<synchronous>, transform_indices = @transform_2, window_bounds = array<i64: 8, 1>}, {transform_indices = @transform_3, window_bounds = array<i64: 1, 8, 128>}]} {
    %c0 = arith.constant 0 : index
    %c0_0 = arith.constant 0 : index
    %0 = vector.load %arg3[%c0, %c0_0] : memref<8x16xf32, #tpu.memory_space<vmem>>, vector<8x16xf32>
    %c0_1 = arith.constant 0 : index
    %c0_2 = arith.constant 0 : index
    %c0_3 = arith.constant 0 : index
    %1 = vector.load %arg2[%c0_1, %c0_2, %c0_3] : memref<1x16x128xf32, #tpu.memory_space<vmem>>, vector<1x16x128xf32>
    %2 = vector.shape_cast %1 : vector<1x16x128xf32> to vector<16x128xf32>
    %cst = arith.constant dense<0.000000e+00> : vector<8x128xf32>
    %3 = tpu.matmul %0, %2, %cst {dimension_numbers = #tpu.dot_dimension_numbers<[1], [0], [0], [1], [0, 0, 1, 1], [], []>} : vector<8x16xf32>, vector<16x128xf32>, vector<8x128xf32> -> vector<8x128xf32>
    %c0_4 = arith.constant 0 : index
    %c0_5 = arith.constant 0 : index
    %4 = vector.load %arg4[%c0_4, %c0_5] : memref<8x1xf32, #tpu.memory_space<vmem>>, vector<8x1xf32>
    %5 = vector.broadcast %4 : vector<8x1xf32> to vector<8x128xf32>
    %6 = arith.addf %3, %5 : vector<8x128xf32>
    %7 = arith.negf %6 : vector<8x128xf32>
    %8 = math.exp %7 : vector<8x128xf32>
    %cst_6 = arith.constant 1.000000e+00 : f32
    %9 = vector.broadcast %cst_6 : f32 to vector<8x128xf32>
    %10 = arith.addf %9, %8 : vector<8x128xf32>
    %11 = arith.divf %9, %10 : vector<8x128xf32>
    %12 = arith.mulf %6, %11 : vector<8x128xf32>
    %c0_7 = arith.constant 0 : index
    %c0_8 = arith.constant 0 : index
    %c0_9 = arith.constant 0 : index
    %13 = vector.load %arg5[%c0_7, %c0_8, %c0_9] : memref<1x8x128xf32, #tpu.memory_space<vmem>>, vector<1x8x128xf32>
    %14 = vector.shape_cast %13 : vector<1x8x128xf32> to vector<8x128xf32>
    %15 = vector.shape_cast %12 : vector<8x128xf32> to vector<1x8x128xf32>
    tpu.vector_store %arg5[%c0_7, %c0_8, %c0_9], %15 {strides = array<i32>} : memref<1x8x128xf32, #tpu.memory_space<vmem>>, vector<1x8x128xf32>,
    return
  }
  func.func @transform_0(%arg0: i32, %arg1: i32) -> (i32, i32, i32) {
    %c0_i32 = arith.constant 0 : i32
    %c0_i32_0 = arith.constant 0 : i32
    return %arg0, %c0_i32, %arg1 : i32, i32, i32
  }
  func.func @transform_1(%arg0: i32, %arg1: i32) -> (i32, i32) {
    %c0_i32 = arith.constant 0 : i32
    %c0_i32_0 = arith.constant 0 : i32
    %c0_i32_1 = arith.constant 0 : i32
    return %c0_i32, %c0_i32_0 : i32, i32
  }
  func.func @transform_2(%arg0: i32, %arg1: i32) -> (i32, i32) {
    %c0_i32 = arith.constant 0 : i32
    %c0_i32_0 = arith.constant 0 : i32
    %c0_i32_1 = arith.constant 0 : i32
    return %c0_i32, %c0_i32_0 : i32, i32
  }
  func.func @transform_3(%arg0: i32, %arg1: i32) -> (i32, i32, i32) {
    %c0_i32 = arith.constant 0 : i32
    %c0_i32_0 = arith.constant 0 : i32
    return %arg0, %c0_i32, %arg1 : i32, i32, i32
  }
}

</mosaic_0001>

<bundles_post_ra>
// kernel: focus_forward.1
= control target key start
LH: loop header
LB: loop body
LE: loop exit
PB: predicated region body
PF: predicated region fallthrough
CT: control target
= control target key end

     0   :  { %s419_s12 = smov 0   ;;  %s421_s13 = smov 0   ;;  %s462_s0 = inlined_call_operand.vmem [shape: f32[2,16,128], index: 0, kind: input, shape index: {}]   ;;  %s463_s1 = inlined_call_operand.vmem [shape: f32[8,16], index: 1, kind: input, shape index: {}]   ;;  %s464_s2 = inlined_call_operand.vmem [shape: f32[8,1], index: 2, kind: input, shape index: {}]   ;;  %s465_s3 = inlined_call_operand.vmem [shape: f32[2,8,128], index: 3, kind: output, shape index: {}]  }
   0x1   :  { %s423_s14 = smov 0  }
   0x2 LB: > { %s25_s15 = sadd.s32 1, %s392_s13  ;;  %p335_p0 = scmp.ge.s32.totalorder %s396_s14, 1  ;;  %s396_s14 = sphi %s423_s14, %s13_s14   ;;  %s392_s13 = sphi %s421_s13, %s467_s13   ;;  %s388_s12 = sphi %s419_s12, %s466_s12  }
   0x3   : > { %p27_p1 = scmp.ge.s32.totalorder %s25_s15, 2  ;;  %p156_p2 = scmp.lt.s32.totalorder %s396_s14, 3 }
   0x5   : > { %s469_s15 = smov (%p27_p1, %s25_s15), 0  ;;  %p157_p3 = pnand %p335_p0, %p156_p2 }
   0x6   : > { %p185_p4 = scmp.lt.s32.totalorder (!%p157_p3), %s388_s12, 1 }
   0x7   : > { %160 = sbr.rel (%p157_p3) target bundleno = 178 (0xb2), region = 32 }
   0xc   : > { %v203_v0 = vld [vmem:[%s464_s2] sm:$0xff]  ;;  %v398_v1 = vmov 0   ;;  %s471_s12 = smov (!%p185_p4, %s388_s12), 1  ;;  %vm209_vm0 = vcmask 130048  }
   0xd   : > { %369 = vset.pattern.permute.xlu0 %v398_v1  ;;  %s343_s18 = sshll.u32 %s471_s12, 4  ;;  %v200_v4 = vld [vmem:[%s463_s1] sm:$0xff]  ;;  %s338_s24 = sshll.u32 %s471_s12, 3 }
   0xe   : > { %206 = vperm.xlu0 %369, %v203_v0   ;;  %s192_s21 = scalar_lea.vmem %s462_s0, %s343_s18  ;;  %s199_s27 = scalar_lea.vmem %s465_s3, %s338_s24 }
   0xf   : > { %v202_v2 = vld [vmem:[%s192_s21 + $0x8] sm:$0xff]  ;;  %v201_v3 = vld [vmem:[%s192_s21] sm:$0xff] }
  0x10   : > { %227 = vmatpush.msra.mxu0 %v202_v2 }
  0x12   : > { %228 = vmatpush.msra.mxu0 %v201_v3 }
  0x13   : > { %339 = vmatmul.msk.f32.vlgmr.msra.gmra.mxu0 %vm209_vm0, %v200_v4 }
  0x80   : > { %v207_v5 = vpop.permute.xlu0 %206 }
  0x90   : > { %v230_v6 = vpop.f32.mrf.mxu0 }
  0x91   : > { %v231_v7 = vadd.f32 %v230_v6, %v207_v5 }
  0x93   : > { %v340_v8 = vmul.f32 -1.442695, %v231_v7 }
  0x95   : > { %370 = vpow2.f32 %v340_v8 }
  0x9b   : > { %v371_v9 = vpop.eup %370 }
  0x9c   : > { %v236_v10 = vadd.f32 1.0, %v371_v9 }
  0x9e   : > { %372 = vrcp.f32 %v236_v10  ;;  %v248_v14 = vand.u32 2147483648, %v236_v10  ;;  %v246_v16 = vand.u32 2147483647, %v236_v10  ;;  %vm242_vm2 = vweird.f32 %v236_v10 }
  0xa0   : > { %v249_v18 = vor.u32 1.1754944e-38, %v248_v14  ;;  %vm247_vm4 = vcmp.eq.f32.partialorder %v246_v16, 8.507059e+37 }
  0xa4   : > { %v373_v11 = vpop.eup %372 }
  0xa5   : > { %v238_v12 = vmul.f32 %v373_v11, %v236_v10  ;;  %vm243_vm1 = vweird.f32 %v373_v11 }
  0xa6   : > { %vm244_vm3 = vmor %vm242_vm2, %vm243_vm1 }
  0xa7   : > { %v239_v13 = vsub.f32 1.0, %v238_v12 }
  0xa9   : > { %v240_v15 = vmul.f32 %v373_v11, %v239_v13 }
  0xab   : > { %v241_v17 = vadd.f32 %v373_v11, %v240_v15 }
  0xad   : > { %v245_v19 = vsel %vm244_vm3, %v373_v11, %v241_v17 }
  0xae   : > { %v250_v20 = vsel %vm247_vm4, %v249_v18, %v245_v19 }
  0xaf   : > { %v252_v21 = vmul.f32 %v250_v20, %v231_v7 }
  0xb1   : > { %253 = vst [vmem:[%s199_s27] sm:$0xff] %v252_v21 }
  0xb2 PF: > { %s13_s14 = sadd.s32 1, %s396_s14   ;;  %s466_s12 = smov %s392_s13 }
  0xb3   : > { %p10_p5 = scmp.ge.s32.totalorder %s13_s14, 4   ;;  %s467_s13 = smov %s469_s15 }
  0xb5   :  { %12 = sbr.rel (!%p10_p5) target bundleno = 2 (0x2), region = 62 }

</bundles_post_ra>
